<compile_context>
chip_gen: v7x
topology: tpu7x:2x2x1
jax: 0.10.0
libtpu: 0.0.40
codegen_flags: <defaults>
</compile_context>

<pallas_src>
import functools

import jax
import jax.numpy as jnp
import numpy as np
from jax import lax
from jax.experimental import pallas as pl
from jax.experimental.pallas import tpu as pltpu

LANE = 128          # pad output-channel dims to a full lane width
DEF_TM = 1024       # rows per tile      (sweep 512-2048 for prod sizes)
DEF_TK = 2048       # reduction (K) tile


def _chip_kind():
    try:
        return jax.devices()[0].device_kind.lower()
    except Exception:
        return ""


_KIND = _chip_kind()
# v5e/v6e: 128 MiB physical VMEM -> bigger scoped budget + resident weights OK.
# v7x (64 MiB physical) / unknown: stay conservative.
_BIG_VMEM = ("v5" in _KIND) or ("v6" in _KIND)
_VMEM_LIMIT = (64 if _BIG_VMEM else 32) * 1024 * 1024
_RESIDENT_W_BYTES = 16 * 1024 * 1024 if _BIG_VMEM else 0
# v6e/v7x have a bf16 VPU -> fused activation natively in bf16; v5e keeps f32 math.
_BF16_ACT = "v5" not in _KIND


def _round_up(a, b):
    return (a + b - 1) // b * b


def _pad2d(a, rows, cols, dtype):
    a = a.astype(dtype)
    if a.shape == (rows, cols):
        return a
    return jnp.pad(a, ((0, rows - a.shape[0]), (0, cols - a.shape[1])))


def _tiles(M, K):
    tm = min(DEF_TM, _round_up(M, 8))
    Mp = _round_up(M, tm)
    if K <= DEF_TK:
        tk, Kp = K, K
    else:
        tk, Kp = DEF_TK, _round_up(K, DEF_TK)
    return tm, tk, Mp, Kp, Mp // tm, Kp // tk


def _row_tile(Mp, cap=2048):
    """Largest multiple-of-8 tile <= cap that divides Mp (Mp is a multiple of 8)."""
    t = min(cap, Mp)
    while Mp % t:
        t -= 8
    return t


# ------------------------------ Pallas kernels ------------------------------ #

def _matmul_act_kernel(a_ref, w_ref, o_ref, acc_ref, *, act, nk, tk,
                       resident_w, bf16_act):
    """(activation -> matmul) with K accumulation. a:(tm,tk) bf16, w bf16."""
    k = pl.program_id(1)

    @pl.when(k == 0)
    def _():
        acc_ref[...] = jnp.zeros_like(acc_ref)

    a = a_ref[...]
    if not bf16_act:                       # v5e: no bf16 VALU -> fp32 elementwise
        a = a.astype(jnp.float32)
    if act == "leaky_relu":
        a = jnp.where(a >= 0, a, 0.2 * a)
    elif act == "relu":
        a = jnp.maximum(a, 0.0)

    if resident_w:                         # full weight held in VMEM; slice the K tile
        w = w_ref[pl.ds(pl.multiple_of(k * tk, tk), tk), :]
    else:
        w = w_ref[...]
    acc_ref[...] += jnp.dot(a.astype(jnp.bfloat16), w,
                            preferred_element_type=jnp.float32)

    @pl.when(k == nk - 1)
    def _():
        o_ref[...] = acc_ref[...].astype(o_ref.dtype)


def _matmul_relu_bnstats_kernel(a_ref, w_ref, o_ref, sum_ref, ssq_ref, acc_ref,
                                *, nk, bf16_act):
    """ReLU -> matmul; per-channel sum / sum-of-squares fused into the epilogue.

    Grid is (phase, m, k); the stats blocks are per-phase resident accumulators,
    so the phase axis may be 'parallel' (v7x megacore) with no race.
    """
    m = pl.program_id(1)
    k = pl.program_id(2)

    @pl.when((m == 0) & (k == 0))
    def _():
        sum_ref[...] = jnp.zeros_like(sum_ref)
        ssq_ref[...] = jnp.zeros_like(ssq_ref)

    @pl.when(k == 0)
    def _():
        acc_ref[...] = jnp.zeros_like(acc_ref)

    a = a_ref[...]
    if not bf16_act:
        a = a.astype(jnp.float32)
    a = jnp.maximum(a, 0.0)                              # fused ReLU
    acc_ref[...] += jnp.dot(a.astype(jnp.bfloat16), w_ref[...],
                            preferred_element_type=jnp.float32)

    @pl.when(k == nk - 1)
    def _():
        u = acc_ref[...]
        # bf16 pre-BN intermediate halves its HBM round-trip; stats stay exact f32.
        o_ref[...] = u.astype(o_ref.dtype)
        sum_ref[...] += jnp.sum(u, axis=0, keepdims=True)
        ssq_ref[...] += jnp.sum(u * u, axis=0, keepdims=True)


def _bn_apply_kernel(u_ref, scale_ref, shift_ref, o_ref):
    """Training-mode BN apply: single FMA with precomputed per-channel scale/shift."""
    o_ref[...] = u_ref[...].astype(jnp.float32) * scale_ref[...] + shift_ref[...]


# ------------------------------ kernel wrappers ------------------------------ #

def matmul_act(a, w, act, out_dtype):
    """activation(a) @ w, tiled over (M, K); output channels padded to 128 lanes."""
    M, K = a.shape
    Kw, N = w.shape
    assert K == Kw
    Np = _round_up(N, LANE)
    tm, tk, Mp, Kp, nm, nk = _tiles(M, K)
    a_p = _pad2d(a, Mp, Kp, jnp.bfloat16)
    w_p = _pad2d(w, Kp, Np, jnp.bfloat16)

    # On big-VMEM chips hold the whole weight resident (constant block index ->
    # fetched once) so it is not re-streamed per M tile.
    resident_w = (nk > 1) and (2 * Kp * Np <= _RESIDENT_W_BYTES)
    if resident_w:
        w_spec = pl.BlockSpec((Kp, Np), lambda m, k: (0, 0))
    else:
        w_spec = pl.BlockSpec((tk, Np), lambda m, k: (k, 0))

    cost = pl.CostEstimate(
        flops=2 * Mp * Kp * Np, transcendentals=0,
        bytes_accessed=a_p.size * 2 + w_p.size * 2
                       + Mp * Np * jnp.dtype(out_dtype).itemsize)
    out = pl.pallas_call(
        functools.partial(_matmul_act_kernel, act=act, nk=nk, tk=tk,
                          resident_w=resident_w, bf16_act=_BF16_ACT),
        out_shape=jax.ShapeDtypeStruct((Mp, Np), out_dtype),
        grid=(nm, nk),
        in_specs=[pl.BlockSpec((tm, tk), lambda m, k: (m, k)), w_spec],
        out_specs=pl.BlockSpec((tm, Np), lambda m, k: (m, 0)),
        scratch_shapes=[pltpu.VMEM((tm, Np), jnp.float32)],
        compiler_params=pltpu.CompilerParams(
            dimension_semantics=("parallel", "arbitrary"),
            vmem_limit_bytes=_VMEM_LIMIT),
        cost_estimate=cost,
    )(a_p, w_p)
    return out[:M, :N]


def matmul_relu_bnstats(a, w):
    """Per-phase ReLU(a[p]) @ w[p] plus fused per-(phase,channel) sum / sumsq.

    a: (P, M, K), w: (P, K, N). Returns (u[P,Mp,Np] bf16, sum[P,1,Np], ssq[P,1,Np]).
    """
    P, M, K = a.shape
    Pw, Kw, N = w.shape
    assert P == Pw and K == Kw
    Np = _round_up(N, LANE)
    tm, tk, Mp, Kp, nm, nk = _tiles(M, K)
    a_p = jnp.pad(a.astype(jnp.bfloat16), ((0, 0), (0, Mp - M), (0, Kp - K)))
    w_p = jnp.pad(w.astype(jnp.bfloat16), ((0, 0), (0, Kp - K), (0, Np - N)))
    cost = pl.CostEstimate(
        flops=2 * P * Mp * Kp * Np + 3 * P * Mp * Np, transcendentals=0,
        bytes_accessed=a_p.size * 2 + w_p.size * 2 + P * Mp * Np * 2)
    u, s, ss = pl.pallas_call(
        functools.partial(_matmul_relu_bnstats_kernel, nk=nk, bf16_act=_BF16_ACT),
        out_shape=(jax.ShapeDtypeStruct((P, Mp, Np), jnp.bfloat16),
                   jax.ShapeDtypeStruct((P, 1, Np), jnp.float32),
                   jax.ShapeDtypeStruct((P, 1, Np), jnp.float32)),
        grid=(P, nm, nk),
        in_specs=[pl.BlockSpec((None, tm, tk), lambda p, m, k: (p, m, k)),
                  pl.BlockSpec((None, tk, Np), lambda p, m, k: (p, k, 0))],
        out_specs=(pl.BlockSpec((None, tm, Np), lambda p, m, k: (p, m, 0)),
                   pl.BlockSpec((None, 1, Np), lambda p, m, k: (p, 0, 0)),
                   pl.BlockSpec((None, 1, Np), lambda p, m, k: (p, 0, 0))),
        scratch_shapes=[pltpu.VMEM((tm, Np), jnp.float32)],
        # Phase axis parallel (uses both v7x cores); m/k stay serial because the
        # per-phase stats blocks are resident accumulators across them.
        compiler_params=pltpu.CompilerParams(
            dimension_semantics=("parallel", "arbitrary", "arbitrary"),
            vmem_limit_bytes=_VMEM_LIMIT),
        cost_estimate=cost,
    )(a_p, w_p)
    return u, s, ss


def bn_apply(u, scale, shift):
    """u: (P, Mp, Np) bf16; scale/shift: (1, Np) f32. Returns f32 (P, Mp, Np)."""
    P, Mp, Np = u.shape
    tm = _row_tile(Mp)
    nm = Mp // tm
    return pl.pallas_call(
        _bn_apply_kernel,
        out_shape=jax.ShapeDtypeStruct((P, Mp, Np), jnp.float32),
        grid=(P, nm),
        in_specs=[pl.BlockSpec((None, tm, Np), lambda p, m: (p, m, 0)),
                  pl.BlockSpec((1, Np), lambda p, m: (0, 0)),
                  pl.BlockSpec((1, Np), lambda p, m: (0, 0))],
        out_specs=pl.BlockSpec((None, tm, Np), lambda p, m: (p, m, 0)),
        compiler_params=pltpu.CompilerParams(
            dimension_semantics=("parallel", "parallel"),
            vmem_limit_bytes=_VMEM_LIMIT),
    )(u, scale, shift)


# --------------------------------- glue (JAX) -------------------------------- #

def _im2col_nhwc(x, k, stride):
    """x: [N, Hp, Wp, C] (already padded) -> [N*Ho*Wo, k*k*C]; columns = (kh, kw, c)."""
    N, Hp, Wp, C = x.shape
    Ho = (Hp - k) // stride + 1
    Wo = (Wp - k) // stride + 1
    cols = []
    for i in range(k):
        for j in range(k):
            cols.append(x[:, i:i + stride * (Ho - 1) + 1:stride,
                             j:j + stride * (Wo - 1) + 1:stride, :])
    p = jnp.stack(cols, axis=3)                       # [N, Ho, Wo, k*k, C]
    return p.reshape(N * Ho * Wo, k * k * C), (Ho, Wo)


def unet_innermost_forward(x, w_down, w_up, gamma, beta):
    """x: [N, outer_nc, H, W] (NCHW). Returns [N, 2*outer_nc, H, W]."""
    N, Co, H, W = x.shape
    Ci = w_down.shape[0]                              # inner_nc

    # channels-last activations; bf16 at the MXU boundary
    x_nhwc = x.transpose(0, 2, 3, 1)
    xb = x_nhwc.astype(jnp.bfloat16)

    # ---- down: LeakyReLU(0.2) -> Conv2d(Co -> Ci, k=4, s=2, p=1)   (act fused)
    x_pad = jnp.pad(xb, ((0, 0), (1, 1), (1, 1), (0, 0)))
    p1, (Ho, Wo) = _im2col_nhwc(x_pad, 4, 2)
    w1 = w_down.transpose(2, 3, 1, 0).reshape(16 * Co, Ci)      # rows = (kh, kw, c_in)
    d = matmul_act(p1, w1, act="leaky_relu", out_dtype=jnp.bfloat16)
    d = d.reshape(N, Ho, Wo, Ci)                      # stays channels-last

    # ---- up: ReLU -> ConvTranspose2d(Ci -> Co, k=4, s=2, p=1)
    # 4-phase decomposition: output pixel (2a+r_h, 2b+r_w) only uses kernel taps
    # kh = 3 - r_h - 2*t_h, kw = 3 - r_w - 2*t_w over the 2x2 input window
    # d[a + r_h + t_h - 1, b + r_w + t_w - 1]  (zero outside).  Per phase this is a
    # stride-1, 2x2-tap conv -> K = 4*Ci instead of a 16*Ci zero-dilated im2col.
    d_pad = jnp.pad(d, ((0, 0), (1, 1), (1, 1), (0, 0)))
    patches, weights = [], []
    for r_h in range(2):
        for r_w in range(2):
            crop = d_pad[:, r_h:r_h + Ho + 1, r_w:r_w + Wo + 1, :]
            p_ph, _ = _im2col_nhwc(crop, 2, 1)                  # (N*Ho*Wo, 4*Ci)
            patches.append(p_ph)
            w_sel = jnp.stack(
                [jnp.stack([w_up[:, :, 3 - r_h - 2 * t_h, 3 - r_w - 2 * t_w]
                            for t_w in range(2)], axis=0)
                 for t_h in range(2)], axis=0)                  # [t_h, t_w, Ci, Co]
            weights.append(w_sel.reshape(4 * Ci, Co))
    p2 = jnp.stack(patches, axis=0)                   # (4, M_ph, 4*Ci)
    w2 = jnp.stack(weights, axis=0)                   # (4, 4*Ci, Co)
    u, s, ss = matmul_relu_bnstats(p2, w2)            # BN stats fused into epilogue
    Np = u.shape[-1]
    M_ph = N * Ho * Wo

    # ---- BatchNorm2d(Co), training-mode batch statistics (biased variance)
    count = float(4 * M_ph)                           # == N * H * W
    s_tot = s.sum(axis=(0, 1))                        # (Np,)
    ss_tot = ss.sum(axis=(0, 1))
    mean = s_tot / count
    var = jnp.maximum(ss_tot / count - mean * mean, 0.0)   # clamp: cancellation-safe
    g = jnp.zeros((Np,), jnp.float32).at[:Co].set(gamma.astype(jnp.float32))
    b = jnp.zeros((Np,), jnp.float32).at[:Co].set(beta.astype(jnp.float32))
    scale = g * lax.rsqrt(var + 1e-5)
    shift = b - mean * scale
    u_bn = bn_apply(u, scale.reshape(1, Np), shift.reshape(1, Np))    # (4, Mp, Np) f32

    # interleave the 4 output parities back to [N, 2Ho, 2Wo, Co]
    u_bn = u_bn[:, :M_ph, :Co].reshape(2, 2, N, Ho, Wo, Co)
    u_bn = u_bn.transpose(2, 3, 0, 4, 1, 5).reshape(N, 2 * Ho, 2 * Wo, Co)

    # ---- skip connection: cat([model(x), x], dim=channel)
    # TODO(synk): fuse the concat into bn_apply's output layout to save one pass.
    out = jnp.concatenate([u_bn, x_nhwc.astype(jnp.float32)], axis=-1)
    return out.transpose(0, 3, 1, 2)


# ------------------------------ pure-JAX reference --------------------------- #

def reference_forward(x, w_down, w_up, gamma, beta, mirror_bf16=False):
    """Pure-JAX reference. mirror_bf16=True reproduces the kernel's bf16 casts."""
    f32 = jnp.float32

    def rnd(a):
        return a.astype(jnp.bfloat16).astype(f32) if mirror_bf16 else a

    a = rnd(x)
    a = jnp.where(a >= 0, a, 0.2 * a)
    a = rnd(a)
    d = lax.conv_general_dilated(a, rnd(w_down), (2, 2), ((1, 1), (1, 1)),
                                 dimension_numbers=("NCHW", "OIHW", "NCHW"),
                                 preferred_element_type=f32)
    r = jnp.maximum(rnd(d), 0.0)
    r = rnd(r)
    w_up_conv = jnp.flip(rnd(w_up), axis=(2, 3)).transpose(1, 0, 2, 3)  # [Co,Ci,kh,kw]
    u = lax.conv_general_dilated(r, w_up_conv, (1, 1), ((2, 2), (2, 2)),
                                 lhs_dilation=(2, 2),
                                 dimension_numbers=("NCHW", "OIHW", "NCHW"),
                                 preferred_element_type=f32)
    mean = u.mean(axis=(0, 2, 3), keepdims=True)
    var = ((u - mean) ** 2).mean(axis=(0, 2, 3), keepdims=True)
    u_bn = ((u - mean) * lax.rsqrt(var + 1e-5)
            * gamma.reshape(1, -1, 1, 1) + beta.reshape(1, -1, 1, 1))
    return jnp.concatenate([u_bn, x], axis=1)


# ------------------------------------- main ---------------------------------- #

if __name__ == "__main__":
    key = jax.random.PRNGKey(0)
    k1, k2, k3, k4, k5 = jax.random.split(key, 5)

    N, outer_nc, inner_nc, H, W = 2, 4, 8, 16, 16

    x = jax.random.normal(k1, (N, outer_nc, H, W), jnp.float32)
    # Conv2d(outer_nc -> inner_nc): weight [inner_nc, outer_nc, 4, 4], bias=False
    w_down = 0.2 * jax.random.normal(k2, (inner_nc, outer_nc, 4, 4), jnp.float32)
    # ConvTranspose2d(inner_nc -> outer_nc): weight [inner_nc, outer_nc, 4, 4], bias=False
    w_up = 0.2 * jax.random.normal(k3, (inner_nc, outer_nc, 4, 4), jnp.float32)
    # BatchNorm2d(outer_nc) affine parameters
    gamma = 1.0 + 0.1 * jax.random.normal(k4, (outer_nc,), jnp.float32)
    beta = 0.1 * jax.random.normal(k5, (outer_nc,), jnp.float32)

    fwd = jax.jit(unet_innermost_forward)
    out = jax.block_until_ready(fwd(x, w_down, w_up, gamma, beta))
    assert out.shape == (N, 2 * outer_nc, H, W)

    # Tight check vs a reference that mirrors the kernel's bf16 MXU casts.
    ref_bf16 = reference_forward(x, w_down, w_up, gamma, beta, mirror_bf16=True)
    np.testing.assert_allclose(np.asarray(out), np.asarray(ref_bf16),
                               rtol=2e-2, atol=2e-2)

    # Looser check vs the exact fp32 PyTorch-semantics reference (bf16 tolerance).
    ref_f32 = reference_forward(x, w_down, w_up, gamma, beta, mirror_bf16=False)
    np.testing.assert_allclose(np.asarray(out), np.asarray(ref_f32),
                               rtol=5e-2, atol=5e-2)

    print("KERNEL_OK")
</pallas_src>

<mosaic_0001>
module attributes {stable_mosaic.version = 11 : i64} {
  func.func @_matmul_act_kernel(%arg0: i32, %arg1: i32, %arg2: memref<128x64xbf16, #tpu.memory_space<vmem>>, %arg3: memref<64x128xbf16, #tpu.memory_space<vmem>>, %arg4: memref<128x128xbf16, #tpu.memory_space<vmem>>, %arg5: memref<128x128xf32, #tpu.memory_space<vmem>>) attributes {dimension_semantics = [#tpu.dimension_semantics<parallel>, #tpu.dimension_semantics<arbitrary>], iteration_bounds = array<i64: 1, 1>, scalar_prefetch = 0 : i64, scratch_operands = 1 : i64, tpu.core_type = #tpu.core_type<tc>, window_params = [{transform_indices = @transform_0, window_bounds = array<i64: 128, 64>}, {transform_indices = @transform_1, window_bounds = array<i64: 64, 128>}, {transform_indices = @transform_2, window_bounds = array<i64: 128, 128>}]} {
    %c0_i32 = arith.constant 0 : i32
    %0 = arith.cmpi eq, %arg1, %c0_i32 : i32
    %1 = arith.extui %0 : i1 to i32
    %c0_i32_0 = arith.constant 0 : i32
    %2 = arith.cmpi ne, %1, %c0_i32_0 : i32
    scf.if %2 {
      %cst_12 = arith.constant 0.000000e+00 : f32
      %17 = vector.broadcast %cst_12 : f32 to vector<128x128xf32>
      %c0_13 = arith.constant 0 : index
      %c0_14 = arith.constant 0 : index
      %18 = vector.load %arg5[%c0_13, %c0_14] : memref<128x128xf32, #tpu.memory_space<vmem>>, vector<128x128xf32>
      tpu.vector_store %arg5[%c0_13, %c0_14], %17 {strides = array<i32>} : memref<128x128xf32, #tpu.memory_space<vmem>>, vector<128x128xf32>,
    } else {
    }
    %c0 = arith.constant 0 : index
    %c0_1 = arith.constant 0 : index
    %3 = vector.load %arg2[%c0, %c0_1] : memref<128x64xbf16, #tpu.memory_space<vmem>>, vector<128x64xbf16>
    %cst = arith.constant 0.000000e+00 : bf16
    %4 = vector.broadcast %cst : bf16 to vector<128x64xbf16>
    %5 = arith.cmpf oge, %3, %4 : vector<128x64xbf16>
    %cst_2 = arith.constant 2.001950e-01 : bf16
    %6 = vector.broadcast %cst_2 : bf16 to vector<128x64xbf16>
    %7 = arith.mulf %6, %3 : vector<128x64xbf16>
    %8 = arith.select %5, %3, %7 : vector<128x64xi1>, vector<128x64xbf16>
    %c0_3 = arith.constant 0 : index
    %c0_4 = arith.constant 0 : index
    %9 = vector.load %arg3[%c0_3, %c0_4] : memref<64x128xbf16, #tpu.memory_space<vmem>>, vector<64x128xbf16>
    %c0_5 = arith.constant 0 : index
    %c0_6 = arith.constant 0 : index
    %10 = vector.load %arg5[%c0_5, %c0_6] : memref<128x128xf32, #tpu.memory_space<vmem>>, vector<128x128xf32>
    %cst_7 = arith.constant dense<0.000000e+00> : vector<128x128xf32>
    %11 = tpu.matmul %8, %9, %cst_7 {dimension_numbers = #tpu.dot_dimension_numbers<[1], [0], [0], [1], [0, 0, 1, 1], [], []>} : vector<128x64xbf16>, vector<64x128xbf16>, vector<128x128xf32> -> vector<128x128xf32>
    %12 = arith.addf %10, %11 : vector<128x128xf32>
    %c0_8 = arith.constant 0 : index
    %c0_9 = arith.constant 0 : index
    %13 = vector.load %arg5[%c0_8, %c0_9] : memref<128x128xf32, #tpu.memory_space<vmem>>, vector<128x128xf32>
    tpu.vector_store %arg5[%c0_8, %c0_9], %12 {strides = array<i32>} : memref<128x128xf32, #tpu.memory_space<vmem>>, vector<128x128xf32>,
    %c0_i32_10 = arith.constant 0 : i32
    %14 = arith.cmpi eq, %arg1, %c0_i32_10 : i32
    %15 = arith.extui %14 : i1 to i32
    %c0_i32_11 = arith.constant 0 : i32
    %16 = arith.cmpi ne, %15, %c0_i32_11 : i32
    scf.if %16 {
      %c0_12 = arith.constant 0 : index
      %c0_13 = arith.constant 0 : index
      %17 = vector.load %arg5[%c0_12, %c0_13] : memref<128x128xf32, #tpu.memory_space<vmem>>, vector<128x128xf32>
      %18 = arith.truncf %17 : vector<128x128xf32> to vector<128x128xbf16>
      %c0_14 = arith.constant 0 : index
      %c0_15 = arith.constant 0 : index
      %19 = vector.load %arg4[%c0_14, %c0_15] : memref<128x128xbf16, #tpu.memory_space<vmem>>, vector<128x128xbf16>
      tpu.vector_store %arg4[%c0_14, %c0_15], %18 {strides = array<i32>} : memref<128x128xbf16, #tpu.memory_space<vmem>>, vector<128x128xbf16>,
    } else {
    }
    return
  }
  func.func @transform_0(%arg0: i32, %arg1: i32) -> (i32, i32) {
    %c0_i32 = arith.constant 0 : i32
    return %arg0, %arg1 : i32, i32
  }
  func.func @transform_1(%arg0: i32, %arg1: i32) -> (i32, i32) {
    %c0_i32 = arith.constant 0 : i32
    %c0_i32_0 = arith.constant 0 : i32
    return %arg1, %c0_i32 : i32, i32
  }
  func.func @transform_2(%arg0: i32, %arg1: i32) -> (i32, i32) {
    %c0_i32 = arith.constant 0 : i32
    %c0_i32_0 = arith.constant 0 : i32
    return %arg0, %c0_i32 : i32, i32
  }
}

module attributes {stable_mosaic.version = 11 : i64} {
  func.func @_matmul_relu_bnstats_kernel(%arg0: i32, %arg1: i32, %arg2: i32, %arg3: memref<1x128x32xbf16, #tpu.memory_space<vmem>>, %arg4: memref<1x32x128xbf16, #tpu.memory_space<vmem>>, %arg5: memref<1x128x128xbf16, #tpu.memory_space<vmem>>, %arg6: memref<1x1x128xf32, #tpu.memory_space<vmem>>, %arg7: memref<1x1x128xf32, #tpu.memory_space<vmem>>, %arg8: memref<128x128xf32, #tpu.memory_space<vmem>>) attributes {dimension_semantics = [#tpu.dimension_semantics<parallel>, #tpu.dimension_semantics<arbitrary>, #tpu.dimension_semantics<arbitrary>], iteration_bounds = array<i64: 4, 1, 1>, scalar_prefetch = 0 : i64, scratch_operands = 1 : i64, tpu.core_type = #tpu.core_type<tc>, window_params = [{transform_indices = @transform_0, window_bounds = array<i64: 1, 128, 32>}, {transform_indices = @transform_1, window_bounds = array<i64: 1, 32, 128>}, {transform_indices = @transform_2, window_bounds = array<i64: 1, 128, 128>}, {transform_indices = @transform_3, window_bounds = array<i64: 1, 1, 128>}, {transform_indices = @transform_4, window_bounds = array<i64: 1, 1, 128>}]} {
    %c0_i32 = arith.constant 0 : i32
    %0 = arith.cmpi eq, %arg1, %c0_i32 : i32
    %c0_i32_0 = arith.constant 0 : i32
    %1 = arith.cmpi eq, %arg2, %c0_i32_0 : i32
    %2 = arith.andi %0, %1 : i1
    %3 = arith.extui %2 : i1 to i32
    %c0_i32_1 = arith.constant 0 : i32
    %4 = arith.cmpi ne, %3, %c0_i32_1 : i32
    scf.if %4 {
      %cst_16 = arith.constant 0.000000e+00 : f32
      %21 = vector.broadcast %cst_16 : f32 to vector<1x128xf32>
      %c0_17 = arith.constant 0 : index
      %c0_18 = arith.constant 0 : index
      %c0_19 = arith.constant 0 : index
      %22 = vector.load %arg6[%c0_17, %c0_18, %c0_19] : memref<1x1x128xf32, #tpu.memory_space<vmem>>, vector<1x1x128xf32>
      %23 = vector.shape_cast %22 : vector<1x1x128xf32> to vector<1x128xf32>
      %24 = vector.shape_cast %21 : vector<1x128xf32> to vector<1x1x128xf32>
      tpu.vector_store %arg6[%c0_17, %c0_18, %c0_19], %24 {strides = array<i32>} : memref<1x1x128xf32, #tpu.memory_space<vmem>>, vector<1x1x128xf32>,
      %cst_20 = arith.constant 0.000000e+00 : f32
      %25 = vector.broadcast %cst_20 : f32 to vector<1x128xf32>
      %c0_21 = arith.constant 0 : index
      %c0_22 = arith.constant 0 : index
      %c0_23 = arith.constant 0 : index
      %26 = vector.load %arg7[%c0_21, %c0_22, %c0_23] : memref<1x1x128xf32, #tpu.memory_space<vmem>>, vector<1x1x128xf32>
      %27 = vector.shape_cast %26 : vector<1x1x128xf32> to vector<1x128xf32>
      %28 = vector.shape_cast %25 : vector<1x128xf32> to vector<1x1x128xf32>
      tpu.vector_store %arg7[%c0_21, %c0_22, %c0_23], %28 {strides = array<i32>} : memref<1x1x128xf32, #tpu.memory_space<vmem>>, vector<1x1x128xf32>,
    } else {
    }
    %c0_i32_2 = arith.constant 0 : i32
    %5 = arith.cmpi eq, %arg2, %c0_i32_2 : i32
    %6 = arith.extui %5 : i1 to i32
    %c0_i32_3 = arith.constant 0 : i32
    %7 = arith.cmpi ne, %6, %c0_i32_3 : i32
    scf.if %7 {
      %cst_16 = arith.constant 0.000000e+00 : f32
      %21 = vector.broadcast %cst_16 : f32 to vector<128x128xf32>
      %c0_17 = arith.constant 0 : index
      %c0_18 = arith.constant 0 : index
      %22 = vector.load %arg8[%c0_17, %c0_18] : memref<128x128xf32, #tpu.memory_space<vmem>>, vector<128x128xf32>
      tpu.vector_store %arg8[%c0_17, %c0_18], %21 {strides = array<i32>} : memref<128x128xf32, #tpu.memory_space<vmem>>, vector<128x128xf32>,
    } else {
    }
    %c0 = arith.constant 0 : index
    %c0_4 = arith.constant 0 : index
    %c0_5 = arith.constant 0 : index
    %8 = vector.load %arg3[%c0, %c0_4, %c0_5] : memref<1x128x32xbf16, #tpu.memory_space<vmem>>, vector<1x128x32xbf16>
    %9 = vector.shape_cast %8 : vector<1x128x32xbf16> to vector<128x32xbf16>
    %cst = arith.constant 0.000000e+00 : bf16
    %10 = vector.broadcast %cst : bf16 to vector<128x32xbf16>
    %11 = arith.maximumf %9, %10 : vector<128x32xbf16>
    %c0_6 = arith.constant 0 : index
    %c0_7 = arith.constant 0 : index
    %12 = vector.load %arg8[%c0_6, %c0_7] : memref<128x128xf32, #tpu.memory_space<vmem>>, vector<128x128xf32>
    %c0_8 = arith.constant 0 : index
    %c0_9 = arith.constant 0 : index
    %c0_10 = arith.constant 0 : index
    %13 = vector.load %arg4[%c0_8, %c0_9, %c0_10] : memref<1x32x128xbf16, #tpu.memory_space<vmem>>, vector<1x32x128xbf16>
    %14 = vector.shape_cast %13 : vector<1x32x128xbf16> to vector<32x128xbf16>
    %cst_11 = arith.constant dense<0.000000e+00> : vector<128x128xf32>
    %15 = tpu.matmul %11, %14, %cst_11 {dimension_numbers = #tpu.dot_dimension_numbers<[1], [0], [0], [1], [0, 0, 1, 1], [], []>} : vector<128x32xbf16>, vector<32x128xbf16>, vector<128x128xf32> -> vector<128x128xf32>
    %16 = arith.addf %12, %15 : vector<128x128xf32>
    %c0_12 = arith.constant 0 : index
    %c0_13 = arith.constant 0 : index
    %17 = vector.load %arg8[%c0_12, %c0_13] : memref<128x128xf32, #tpu.memory_space<vmem>>, vector<128x128xf32>
    tpu.vector_store %arg8[%c0_12, %c0_13], %16 {strides = array<i32>} : memref<128x128xf32, #tpu.memory_space<vmem>>, vector<128x128xf32>,
    %c0_i32_14 = arith.constant 0 : i32
    %18 = arith.cmpi eq, %arg2, %c0_i32_14 : i32
    %19 = arith.extui %18 : i1 to i32
    %c0_i32_15 = arith.constant 0 : i32
    %20 = arith.cmpi ne, %19, %c0_i32_15 : i32
    scf.if %20 {
      %c0_16 = arith.constant 0 : index
      %c0_17 = arith.constant 0 : index
      %21 = vector.load %arg8[%c0_16, %c0_17] : memref<128x128xf32, #tpu.memory_space<vmem>>, vector<128x128xf32>
      %22 = arith.truncf %21 : vector<128x128xf32> to vector<128x128xbf16>
      %c0_18 = arith.constant 0 : index
      %c0_19 = arith.constant 0 : index
      %c0_20 = arith.constant 0 : index
      %23 = vector.load %arg5[%c0_18, %c0_19, %c0_20] : memref<1x128x128xbf16, #tpu.memory_space<vmem>>, vector<1x128x128xbf16>
      %24 = vector.shape_cast %23 : vector<1x128x128xbf16> to vector<128x128xbf16>
      %25 = vector.shape_cast %22 : vector<128x128xbf16> to vector<1x128x128xbf16>
      tpu.vector_store %arg5[%c0_18, %c0_19, %c0_20], %25 {strides = array<i32>} : memref<1x128x128xbf16, #tpu.memory_space<vmem>>, vector<1x128x128xbf16>,
      %c0_21 = arith.constant 0 : index
      %c0_22 = arith.constant 0 : index
      %c0_23 = arith.constant 0 : index
      %26 = vector.load %arg6[%c0_21, %c0_22, %c0_23] : memref<1x1x128xf32, #tpu.memory_space<vmem>>, vector<1x1x128xf32>
      %27 = vector.shape_cast %26 : vector<1x1x128xf32> to vector<1x128xf32>
      %cst_24 = arith.constant dense<0.000000e+00> : vector<128xf32>
      %28 = vector.multi_reduction <add>, %21, %cst_24 [0] : vector<128x128xf32> to vector<128xf32>
      %29 = vector.shape_cast %28 : vector<128xf32> to vector<1x128xf32>
      %30 = arith.addf %27, %29 : vector<1x128xf32>
      %c0_25 = arith.constant 0 : index
      %c0_26 = arith.constant 0 : index
      %c0_27 = arith.constant 0 : index
      %31 = vector.load %arg6[%c0_25, %c0_26, %c0_27] : memref<1x1x128xf32, #tpu.memory_space<vmem>>, vector<1x1x128xf32>
      %32 = vector.shape_cast %31 : vector<1x1x128xf32> to vector<1x128xf32>
      %33 = vector.shape_cast %30 : vector<1x128xf32> to vector<1x1x128xf32>
      tpu.vector_store %arg6[%c0_25, %c0_26, %c0_27], %33 {strides = array<i32>} : memref<1x1x128xf32, #tpu.memory_space<vmem>>, vector<1x1x128xf32>,
      %c0_28 = arith.constant 0 : index
      %c0_29 = arith.constant 0 : index
      %c0_30 = arith.constant 0 : index
      %34 = vector.load %arg7[%c0_28, %c0_29, %c0_30] : memref<1x1x128xf32, #tpu.memory_space<vmem>>, vector<1x1x128xf32>
      %35 = vector.shape_cast %34 : vector<1x1x128xf32> to vector<1x128xf32>
      %36 = arith.mulf %21, %21 : vector<128x128xf32>
      %cst_31 = arith.constant dense<0.000000e+00> : vector<128xf32>
      %37 = vector.multi_reduction <add>, %36, %cst_31 [0] : vector<128x128xf32> to vector<128xf32>
      %38 = vector.shape_cast %37 : vector<128xf32> to vector<1x128xf32>
      %39 = arith.addf %35, %38 : vector<1x128xf32>
      %c0_32 = arith.constant 0 : index
      %c0_33 = arith.constant 0 : index
      %c0_34 = arith.constant 0 : index
      %40 = vector.load %arg7[%c0_32, %c0_33, %c0_34] : memref<1x1x128xf32, #tpu.memory_space<vmem>>, vector<1x1x128xf32>
      %41 = vector.shape_cast %40 : vector<1x1x128xf32> to vector<1x128xf32>
      %42 = vector.shape_cast %39 : vector<1x128xf32> to vector<1x1x128xf32>
      tpu.vector_store %arg7[%c0_32, %c0_33, %c0_34], %42 {strides = array<i32>} : memref<1x1x128xf32, #tpu.memory_space<vmem>>, vector<1x1x128xf32>,
    } else {
    }
    return
  }
  func.func @transform_0(%arg0: i32, %arg1: i32, %arg2: i32) -> (i32, i32, i32) {
    %c0_i32 = arith.constant 0 : i32
    return %arg0, %arg1, %arg2 : i32, i32, i32
  }
  func.func @transform_1(%arg0: i32, %arg1: i32, %arg2: i32) -> (i32, i32, i32) {
    %c0_i32 = arith.constant 0 : i32
    %c0_i32_0 = arith.constant 0 : i32
    return %arg0, %arg2, %c0_i32 : i32, i32, i32
  }
  func.func @transform_2(%arg0: i32, %arg1: i32, %arg2: i32) -> (i32, i32, i32) {
    %c0_i32 = arith.constant 0 : i32
    %c0_i32_0 = arith.constant 0 : i32
    return %arg0, %arg1, %c0_i32 : i32, i32, i32
  }
  func.func @transform_3(%arg0: i32, %arg1: i32, %arg2: i32) -> (i32, i32, i32) {
    %c0_i32 = arith.constant 0 : i32
    %c0_i32_0 = arith.constant 0 : i32
    %c0_i32_1 = arith.constant 0 : i32
    return %arg0, %c0_i32, %c0_i32_0 : i32, i32, i32
  }
  func.func @transform_4(%arg0: i32, %arg1: i32, %arg2: i32) -> (i32, i32, i32) {
    %c0_i32 = arith.constant 0 : i32
    %c0_i32_0 = arith.constant 0 : i32
    %c0_i32_1 = arith.constant 0 : i32
    return %arg0, %c0_i32, %c0_i32_0 : i32, i32, i32
  }
}

module attributes {stable_mosaic.version = 11 : i64} {
  func.func @_bn_apply_kernel(%arg0: i32, %arg1: i32, %arg2: memref<1x128x128xbf16, #tpu.memory_space<vmem>>, %arg3: memref<1x128xf32, #tpu.memory_space<vmem>>, %arg4: memref<1x128xf32, #tpu.memory_space<vmem>>, %arg5: memref<1x128x128xf32, #tpu.memory_space<vmem>>) attributes {dimension_semantics = [#tpu.dimension_semantics<parallel>, #tpu.dimension_semantics<parallel>], iteration_bounds = array<i64: 4, 1>, scalar_prefetch = 0 : i64, scratch_operands = 0 : i64, tpu.core_type = #tpu.core_type<tc>, window_params = [{transform_indices = @transform_0, window_bounds = array<i64: 1, 128, 128>}, {pipeline_mode = #tpu.pipeline_mode<synchronous>, transform_indices = @transform_1, window_bounds = array<i64: 1, 128>}, {pipeline_mode = #tpu.pipeline_mode<synchronous>, transform_indices = @transform_2, window_bounds = array<i64: 1, 128>}, {transform_indices = @transform_3, window_bounds = array<i64: 1, 128, 128>}]} {
    %c0 = arith.constant 0 : index
    %c0_0 = arith.constant 0 : index
    %c0_1 = arith.constant 0 : index
    %0 = vector.load %arg2[%c0, %c0_0, %c0_1] : memref<1x128x128xbf16, #tpu.memory_space<vmem>>, vector<1x128x128xbf16>
    %1 = vector.shape_cast %0 : vector<1x128x128xbf16> to vector<128x128xbf16>
    %2 = arith.extf %1 : vector<128x128xbf16> to vector<128x128xf32>
    %c0_2 = arith.constant 0 : index
    %c0_3 = arith.constant 0 : index
    %3 = vector.load %arg3[%c0_2, %c0_3] : memref<1x128xf32, #tpu.memory_space<vmem>>, vector<1x128xf32>
    %4 = vector.broadcast %3 : vector<1x128xf32> to vector<128x128xf32>
    %5 = arith.mulf %2, %4 : vector<128x128xf32>
    %c0_4 = arith.constant 0 : index
    %c0_5 = arith.constant 0 : index
    %6 = vector.load %arg4[%c0_4, %c0_5] : memref<1x128xf32, #tpu.memory_space<vmem>>, vector<1x128xf32>
    %7 = vector.broadcast %6 : vector<1x128xf32> to vector<128x128xf32>
    %8 = arith.addf %5, %7 : vector<128x128xf32>
    %c0_6 = arith.constant 0 : index
    %c0_7 = arith.constant 0 : index
    %c0_8 = arith.constant 0 : index
    %9 = vector.load %arg5[%c0_6, %c0_7, %c0_8] : memref<1x128x128xf32, #tpu.memory_space<vmem>>, vector<1x128x128xf32>
    %10 = vector.shape_cast %9 : vector<1x128x128xf32> to vector<128x128xf32>
    %11 = vector.shape_cast %8 : vector<128x128xf32> to vector<1x128x128xf32>
    tpu.vector_store %arg5[%c0_6, %c0_7, %c0_8], %11 {strides = array<i32>} : memref<1x128x128xf32, #tpu.memory_space<vmem>>, vector<1x128x128xf32>,
    return
  }
  func.func @transform_0(%arg0: i32, %arg1: i32) -> (i32, i32, i32) {
    %c0_i32 = arith.constant 0 : i32
    %c0_i32_0 = arith.constant 0 : i32
    return %arg0, %arg1, %c0_i32 : i32, i32, i32
  }
  func.func @transform_1(%arg0: i32, %arg1: i32) -> (i32, i32) {
    %c0_i32 = arith.constant 0 : i32
    %c0_i32_0 = arith.constant 0 : i32
    %c0_i32_1 = arith.constant 0 : i32
    return %c0_i32, %c0_i32_0 : i32, i32
  }
  func.func @transform_2(%arg0: i32, %arg1: i32) -> (i32, i32) {
    %c0_i32 = arith.constant 0 : i32
    %c0_i32_0 = arith.constant 0 : i32
    %c0_i32_1 = arith.constant 0 : i32
    return %c0_i32, %c0_i32_0 : i32, i32
  }
  func.func @transform_3(%arg0: i32, %arg1: i32) -> (i32, i32, i32) {
    %c0_i32 = arith.constant 0 : i32
    %c0_i32_0 = arith.constant 0 : i32
    return %arg0, %arg1, %c0_i32 : i32, i32, i32
  }
}

</mosaic_0001>

<bundles_post_ra>
// kernel: unet_innermost_forward.3
= control target key start
LH: loop header
LB: loop body
LE: loop exit
PB: predicated region body
PF: predicated region fallthrough
CT: control target
= control target key end

     0   :  { %vm185_vm2 = vcmask 523264   ;;  %s696_s1 = inlined_call_operand.vmem [shape: bf16[64,128], index: 1, kind: input, shape index: {}]   ;;  %s697_s0 = inlined_call_operand.vmem [shape: bf16[128,64], index: 0, kind: input, shape index: {}]   ;;  %s698_s2 = inlined_call_operand.vmem [shape: bf16[128,128], index: 2, kind: output, shape index: {}]  }
   0x1   :  { %v585_v0 = vld [vmem:[%s696_s1] sm:$0xff]   ;;  %v586_v1 = vld [vmem:[%s696_s1 + $0x8] sm:$0xff]   ;;  %v587_v2 = vld [vmem:[%s696_s1 + $0x10] sm:$0xff]  }
   0x2   :  { %553 = vmatprep.subr.bf16.mxu0 %v585_v0  ;;  %577 = vmatprep.subr.bf16.mxu1 %v585_v0  ;;  %v33_v3 = vld [vmem:[%s697_s0] sm:$0xf]  ;;  %v34_v4 = vld [vmem:[%s697_s0 + $0x4] sm:$0xf]  ;;  %v35_v13 = vld [vmem:[%s697_s0 + $0x8] sm:$0xf] }
   0x3   :  { %554 = vmatpush3.bf16.msra.mxu0 %v585_v0  ;;  %581 = vmatpush3.bf16.msra.mxu1 %v585_v0  ;;  %v41_v5 = vld [vmem:[%s697_s0 + $0x20] sm:$0xf]  ;;  %vm49_vm0 = vcmp.ge.bf16.partialorder %v33_v3, 0  ;;  %vm50_vm1 = vcmp.ge.bf16.partialorder %v34_v4, 0  ;;  %v65_v6 = vmul.bf16 1045249613, %v33_v3 }
   0x4   :  { %555 = vmatprep.subr.bf16.mxu0 %v586_v1  ;;  %578 = vmatprep.subr.bf16.mxu1 %v586_v1  ;;  %v66_v7 = vmul.bf16 1045249613, %v34_v4  ;;  %v42_v8 = vld [vmem:[%s697_s0 + $0x24] sm:$0xf]  ;;  %vm57_vm3 = vcmp.ge.bf16.partialorder %v41_v5, 0  ;;  %v588_v14 = vld [vmem:[%s696_s1 + $0x18] sm:$0xff]  }
   0x5   :  { %v73_v9 = vmul.bf16 1045249613, %v41_v5  ;;  %v81_v10 = vsel %vm49_vm0, %v33_v3, %v65_v6  ;;  %vm58_vm4 = vcmp.ge.bf16.partialorder %v42_v8, 0  ;;  %v74_v12 = vmul.bf16 1045249613, %v42_v8 }
   0x6   :  { %v82_v11 = vsel %vm50_vm1, %v34_v4, %v66_v7  ;;  %v36_v17 = vld [vmem:[%s697_s0 + $0xc] sm:$0xf]  ;;  %vm51_vm5 = vcmp.ge.bf16.partialorder %v35_v13, 0  ;;  %v67_v18 = vmul.bf16 1045249613, %v35_v13 }
   0x7   :  { %556 = vmatpush3.bf16.msra.mxu0 %v586_v1  ;;  %582 = vmatpush3.bf16.msra.mxu1 %v586_v1  ;;  %v442_v15 = vcombine.low %v81_v10, %v82_v11  ;;  %v89_v16 = vsel %vm57_vm3, %v41_v5, %v73_v9  ;;  %v90_v19 = vsel %vm58_vm4, %v42_v8, %v74_v12  ;;  %vm52_vm6 = vcmp.ge.bf16.partialorder %v36_v17, 0  ;;  %v43_v21 = vld [vmem:[%s697_s0 + $0x28] sm:$0xf]  ;;  %v44_v24 = vld [vmem:[%s697_s0 + $0x2c] sm:$0xf] }
   0x8   :  { %557 = vmatprep.subr.bf16.mxu0 %v587_v2  ;;  %579 = vmatprep.subr.bf16.mxu1 %v587_v2  ;;  %v68_v20 = vmul.bf16 1045249613, %v36_v17  ;;  %v446_v22 = vcombine.low %v89_v16, %v90_v19  ;;  %v83_v23 = vsel %vm51_vm5, %v35_v13, %v67_v18  ;;  %vm59_vm7 = vcmp.ge.bf16.partialorder %v43_v21, 0  ;;  %v37_v28 = vld [vmem:[%s697_s0 + $0x10] sm:$0xf] }
   0x9   :  { %561 = vmatprep.mubr.msk.bf16.mxu0 %vm185_vm2, %v442_v15  ;;  %v75_v25 = vmul.bf16 1045249613, %v43_v21  ;;  %vm60_vm8 = vcmp.ge.bf16.partialorder %v44_v24, 0  ;;  %v76_v27 = vmul.bf16 1045249613, %v44_v24  ;;  %vm53_vm9 = vcmp.ge.bf16.partialorder %v37_v28, 0 }
   0xa   :  { %v84_v26 = vsel %vm52_vm6, %v36_v17, %v68_v20  ;;  %v38_v30 = vld [vmem:[%s697_s0 + $0x14] sm:$0xf]  ;;  %v69_v31 = vmul.bf16 1045249613, %v37_v28  ;;  %569 = vmatprep.mubr.msk.bf16.mxu1 %vm185_vm2, %v446_v22  ;;  %v45_v35 = vld [vmem:[%s697_s0 + $0x30] sm:$0xf] }
   0xb   :  { %558 = vmatpush3.bf16.msra.mxu0 %v587_v2  ;;  %583 = vmatpush3.bf16.msra.mxu1 %v587_v2  ;;  %v91_v29 = vsel %vm59_vm7, %v43_v21, %v75_v25  ;;  %v443_v32 = vcombine.low %v83_v23, %v84_v26  ;;  %v92_v33 = vsel %vm60_vm8, %v44_v24, %v76_v27  ;;  %vm54_vm10 = vcmp.ge.bf16.partialorder %v38_v30, 0  ;;  %v46_v38 = vld [vmem:[%s697_s0 + $0x34] sm:$0xf]  ;;  %v39_v42 = vld [vmem:[%s697_s0 + $0x18] sm:$0xf] }
   0xc   :  { %559 = vmatprep.subr.bf16.mxu0 %v588_v14  ;;  %580 = vmatprep.subr.bf16.mxu1 %v588_v14  ;;  %v70_v34 = vmul.bf16 1045249613, %v38_v30  ;;  %v447_v36 = vcombine.low %v91_v29, %v92_v33  ;;  %v85_v37 = vsel %vm53_vm9, %v37_v28, %v69_v31  ;;  %vm61_vm11 = vcmp.ge.bf16.partialorder %v45_v35, 0  ;;  %v40_v45 = vld [vmem:[%s697_s0 + $0x1c] sm:$0xf] }
   0xd   :  { %v77_v39 = vmul.bf16 1045249613, %v45_v35  ;;  %vm62_vm12 = vcmp.ge.bf16.partialorder %v46_v38, 0  ;;  %v78_v41 = vmul.bf16 1045249613, %v46_v38  ;;  %vm55_vm13 = vcmp.ge.bf16.partialorder %v39_v42, 0 }
   0xe   :  { %v86_v40 = vsel %vm54_vm10, %v38_v30, %v70_v34  ;;  %v71_v46 = vmul.bf16 1045249613, %v39_v42  ;;  %vm56_vm14 = vcmp.ge.bf16.partialorder %v40_v45, 0  ;;  %v72_v48 = vmul.bf16 1045249613, %v40_v45 }
   0xf   :  { %560 = vmatpush3.bf16.msra.mxu0 %v588_v14  ;;  %584 = vmatpush3.bf16.msra.mxu1 %v588_v14  ;;  %v444_v43 = vcombine.low %v85_v37, %v86_v40  ;;  %v93_v44 = vsel %vm61_vm11, %v45_v35, %v77_v39  ;;  %v94_v47 = vsel %vm62_vm12, %v46_v38, %v78_v41  ;;  %v47_v49 = vld [vmem:[%s697_s0 + $0x38] sm:$0xf]  ;;  %v48_v51 = vld [vmem:[%s697_s0 + $0x3c] sm:$0xf] }
  0x10   :  { %v448_v50 = vcombine.low %v93_v44, %v94_v47  ;;  %vm63_vm15 = vcmp.ge.bf16.partialorder %v47_v49, 0  ;;  %v79_v52 = vmul.bf16 1045249613, %v47_v49  ;;  %v87_v53 = vsel %vm55_vm13, %v39_v42, %v71_v46 }
  0x11   :  { %v88_v54 = vsel %vm56_vm14, %v40_v45, %v72_v48  ;;  %vm64_vm0 = vcmp.ge.bf16.partialorder %v48_v51, 0  ;;  %v80_v55 = vmul.bf16 1045249613, %v48_v51 }
  0x12   :  { %562 = vmatmul.mubr.msk.bf16.vlgmr.msra.gmra.mrb[0].mxu0 %vm185_vm2, %v443_v32  ;;  %570 = vmatmul.mubr.msk.bf16.vlgmr.msra.gmra.mrb[0].mxu1 %vm185_vm2, %v447_v36  ;;  %v95_v56 = vsel %vm63_vm15, %v47_v49, %v79_v52  ;;  %v445_v58 = vcombine.low %v87_v53, %v88_v54 }
  0x13   :  { %565 = vmatprep.mubr.msk.bf16.mxu0 %vm185_vm2, %v444_v43  ;;  %573 = vmatprep.mubr.msk.bf16.mxu1 %vm185_vm2, %v448_v50  ;;  %v96_v57 = vsel %vm64_vm0, %v48_v51, %v80_v55 }
  0x14   :  { %v449_v59 = vcombine.low %v95_v56, %v96_v57 }
  0x1a   :  { %566 = vmatmul.mubr.msk.bf16.gmra.mrb[4].mxu0 %vm185_vm2, %v445_v58  ;;  %574 = vmatmul.mubr.msk.bf16.gmra.mrb[4].mxu1 %vm185_vm2, %v449_v59 }
  0xe5   :  { %v563_v60 = vpop.f32.mrb[0].mxu0  ;;  %v571_v61 = vpop.f32.mrb[0].mxu1 }
  0xe6   :  { %v244_v62 = vpop.f32.mrb[1].mxu0  ;;  %v276_v63 = vpop.f32.mrb[1].mxu1 }
  0xe7   :  { %v564_v0 = vpop.f32.mrb[2].mxu0  ;;  %v572_v1 = vpop.f32.mrb[2].mxu1 }
  0xe8   :  { %v502_v2 = vpack.c.bf16 %v564_v0, %v563_v60  ;;  %v522_v3 = vpack.c.bf16 %v572_v1, %v571_v61  ;;  %v247_v4 = vpop.f32.mrb[3].mxu0  ;;  %v279_v5 = vpop.f32.mrb[3].mxu1 }
  0xe9   :  { %v497_v6 = vpack.c.bf16 %v247_v4, %v244_v62  ;;  %v517_v7 = vpack.c.bf16 %v279_v5, %v276_v63 }
  0xea   :  { %534 = vst [vmem:[%s698_s2 + $0x8] sm:$0xff] %v502_v2   ;;  %538 = vst [vmem:[%s698_s2 + $0x28] sm:$0xff] %v522_v3  }
  0xeb   :  { %498 = vst [vmem:[%s698_s2] sm:$0xff] %v497_v6   ;;  %537 = vst [vmem:[%s698_s2 + $0x20] sm:$0xff] %v517_v7  }
  0xed   :  { %v567_v8 = vpop.f32.mrb[4].mxu0  ;;  %v575_v9 = vpop.f32.mrb[4].mxu1 }
  0xee   :  { %v260_v10 = vpop.f32.mrb[5].mxu0  ;;  %v292_v11 = vpop.f32.mrb[5].mxu1 }
  0xef   :  { %v568_v12 = vpop.f32.mrb[6].mxu0  ;;  %v576_v13 = vpop.f32.mrb[6].mxu1 }
  0xf0   :  { %v512_v14 = vpack.c.bf16 %v568_v12, %v567_v8  ;;  %v532_v15 = vpack.c.bf16 %v576_v13, %v575_v9  ;;  %v263_v16 = vpop.f32.mrb[7].mxu0  ;;  %v295_v17 = vpop.f32.mrb[7].mxu1 }
  0xf1   :  { %v507_v18 = vpack.c.bf16 %v263_v16, %v260_v10  ;;  %v527_v19 = vpack.c.bf16 %v295_v17, %v292_v11 }
  0xf2   :  { %536 = vst [vmem:[%s698_s2 + $0x18] sm:$0xff] %v512_v14   ;;  %540 = vst [vmem:[%s698_s2 + $0x38] sm:$0xff] %v532_v15  }
  0xf3   :  { %535 = vst [vmem:[%s698_s2 + $0x10] sm:$0xff] %v507_v18   ;;  %539 = vst [vmem:[%s698_s2 + $0x30] sm:$0xff] %v527_v19  }

// kernel: unet_innermost_forward.5
= control target key start
LH: loop header
LB: loop body
LE: loop exit
PB: predicated region body
PF: predicated region fallthrough
CT: control target
= control target key end

     0   :  { %s513_s12 = smov 0   ;;  %s515_s13 = smov 0   ;;  %s580_s0 = inlined_call_operand.vmem [shape: bf16[4,128,128], index: 0, kind: input, shape index: {}]   ;;  %s581_s1 = inlined_call_operand.vmem [shape: f32[1,128], index: 1, kind: input, shape index: {}]   ;;  %s582_s2 = inlined_call_operand.vmem [shape: f32[1,128], index: 2, kind: input, shape index: {}]   ;;  %s583_s3 = inlined_call_operand.vmem [shape: f32[4,128,128], index: 3, kind: output, shape index: {}]  }
   0x1   :  { %s517_s14 = smov 0  }
   0x2 LB: > { %s25_s15 = sadd.s32 1, %s487_s13  ;;  %p395_p0 = scmp.ge.s32.totalorder %s491_s14, 1  ;;  %s491_s14 = sphi %s517_s14, %s13_s14   ;;  %s487_s13 = sphi %s515_s13, %s585_s13   ;;  %s483_s12 = sphi %s513_s12, %s584_s12  }
   0x3   : > { %p27_p1 = scmp.ge.s32.totalorder %s25_s15, 4  ;;  %p158_p2 = scmp.lt.s32.totalorder %s491_s14, 5 }
   0x5   : > { %s587_s15 = smov (%p27_p1, %s25_s15), 0  ;;  %p159_p3 = pnand %p395_p0, %p158_p2 }
   0x6   : > { %p191_p4 = scmp.lt.s32.totalorder (!%p159_p3), %s483_s12, 3  ;;  %v400_v0 = vld [vmem:[%s581_s1] ss:$0 sm:$0xff] (!%p159_p3) }
   0x7   : > { %162 = sbr.rel (%p159_p3) target bundleno = 34 (0x22), region = 32  ;;  %v401_v9 = vld [vmem:[%s582_s2] ss:$0 sm:$0xff] (!%p159_p3) }
   0xe   : > { %s589_s12 = smov (!%p191_p4, %s483_s12), 3 }
   0xf   : > { %s404_s16 = sshll.u32 %s589_s12, 6  ;;  %s405_s22 = sshll.u32 %s589_s12, 7 }
  0x10   : > { %s534_s19 = scalar_lea.vmem %s580_s0, %s404_s16  ;;  %s549_s27 = scalar_lea.vmem %s583_s3, %s405_s22 }
  0x11   : > { %v407_v1 = vld [vmem:[%s534_s19] sm:$0xff]   ;;  %v438_v2 = vld [vmem:[%s534_s19 + $0x8] sm:$0xff]   ;;  %v439_v3 = vld [vmem:[%s534_s19 + $0x10] sm:$0xff]  }
  0x12   : > { %v408_v4 = vunpack.c.l.bf16 %v407_v1  ;;  %v409_v5 = vunpack.c.h.bf16 %v407_v1  ;;  %v412_v6 = vunpack.c.l.bf16 %v438_v2  ;;  %v413_v7 = vunpack.c.h.bf16 %v438_v2  ;;  %v440_v8 = vld [vmem:[%s534_s19 + $0x18] sm:$0xff]   ;;  %v441_v22 = vld [vmem:[%s534_s19 + $0x20] sm:$0xff]   ;;  %v442_v23 = vld [vmem:[%s534_s19 + $0x28] sm:$0xff]  }
  0x13   : > { %v416_v10 = vunpack.c.l.bf16 %v439_v3  ;;  %v417_v11 = vunpack.c.h.bf16 %v439_v3  ;;  %v420_v12 = vunpack.c.l.bf16 %v440_v8  ;;  %v421_v13 = vunpack.c.h.bf16 %v440_v8  ;;  %v443_v28 = vld [vmem:[%s534_s19 + $0x30] sm:$0xff]   ;;  %v444_v29 = vld [vmem:[%s534_s19 + $0x38] sm:$0xff]  }
  0x14   : > { %v249_v14 = vmul.f32 %v408_v4, %v400_v0  ;;  %v250_v15 = vmul.f32 %v409_v5, %v400_v0  ;;  %v251_v16 = vmul.f32 %v412_v6, %v400_v0  ;;  %v252_v17 = vmul.f32 %v413_v7, %v400_v0 }
  0x15   : > { %v253_v18 = vmul.f32 %v416_v10, %v400_v0  ;;  %v254_v19 = vmul.f32 %v417_v11, %v400_v0  ;;  %v255_v20 = vmul.f32 %v420_v12, %v400_v0  ;;  %v256_v21 = vmul.f32 %v421_v13, %v400_v0 }
  0x16   : > { %v272_v24 = vadd.f32 %v401_v9, %v249_v14  ;;  %v273_v25 = vadd.f32 %v401_v9, %v250_v15  ;;  %v274_v26 = vadd.f32 %v401_v9, %v251_v16  ;;  %v275_v27 = vadd.f32 %v401_v9, %v252_v17 }
  0x17   : > { %v276_v30 = vadd.f32 %v401_v9, %v253_v18  ;;  %v277_v31 = vadd.f32 %v401_v9, %v254_v19  ;;  %v278_v32 = vadd.f32 %v401_v9, %v255_v20  ;;  %v279_v33 = vadd.f32 %v401_v9, %v256_v21 }
  0x18   : > { %288 = vst [vmem:[%s549_s27] sm:$0xff] %v272_v24  ;;  %289 = vst [vmem:[%s549_s27 + $0x8] sm:$0xff] %v273_v25  ;;  %v424_v34 = vunpack.c.l.bf16 %v441_v22  ;;  %v425_v35 = vunpack.c.h.bf16 %v441_v22  ;;  %v428_v36 = vunpack.c.l.bf16 %v442_v23  ;;  %v429_v37 = vunpack.c.h.bf16 %v442_v23 }
  0x19   : > { %290 = vst [vmem:[%s549_s27 + $0x10] sm:$0xff] %v274_v26  ;;  %291 = vst [vmem:[%s549_s27 + $0x18] sm:$0xff] %v275_v27  ;;  %v432_v38 = vunpack.c.l.bf16 %v443_v28  ;;  %v433_v39 = vunpack.c.h.bf16 %v443_v28  ;;  %v436_v40 = vunpack.c.l.bf16 %v444_v29  ;;  %v437_v41 = vunpack.c.h.bf16 %v444_v29 }
  0x1a   : > { %292 = vst [vmem:[%s549_s27 + $0x20] sm:$0xff] %v276_v30  ;;  %293 = vst [vmem:[%s549_s27 + $0x28] sm:$0xff] %v277_v31  ;;  %v257_v42 = vmul.f32 %v424_v34, %v400_v0  ;;  %v258_v43 = vmul.f32 %v425_v35, %v400_v0  ;;  %v259_v44 = vmul.f32 %v428_v36, %v400_v0 }
  0x1b   : > { %294 = vst [vmem:[%s549_s27 + $0x30] sm:$0xff] %v278_v32  ;;  %295 = vst [vmem:[%s549_s27 + $0x38] sm:$0xff] %v279_v33  ;;  %v260_v45 = vmul.f32 %v429_v37, %v400_v0  ;;  %v261_v46 = vmul.f32 %v432_v38, %v400_v0  ;;  %v262_v47 = vmul.f32 %v433_v39, %v400_v0 }
  0x1c   : > { %v263_v48 = vmul.f32 %v436_v40, %v400_v0  ;;  %v264_v49 = vmul.f32 %v437_v41, %v400_v0  ;;  %v280_v50 = vadd.f32 %v401_v9, %v257_v42  ;;  %v281_v51 = vadd.f32 %v401_v9, %v258_v43 }
  0x1d   : > { %v282_v52 = vadd.f32 %v401_v9, %v259_v44  ;;  %v283_v53 = vadd.f32 %v401_v9, %v260_v45  ;;  %v284_v54 = vadd.f32 %v401_v9, %v261_v46  ;;  %v285_v55 = vadd.f32 %v401_v9, %v262_v47 }
  0x1e   : > { %v286_v56 = vadd.f32 %v401_v9, %v263_v48  ;;  %v287_v57 = vadd.f32 %v401_v9, %v264_v49  ;;  %296 = vst [vmem:[%s549_s27 + $0x40] sm:$0xff] %v280_v50  ;;  %297 = vst [vmem:[%s549_s27 + $0x48] sm:$0xff] %v281_v51 }
  0x1f   : > { %298 = vst [vmem:[%s549_s27 + $0x50] sm:$0xff] %v282_v52  ;;  %299 = vst [vmem:[%s549_s27 + $0x58] sm:$0xff] %v283_v53 }
  0x20   : > { %300 = vst [vmem:[%s549_s27 + $0x60] sm:$0xff] %v284_v54  ;;  %301 = vst [vmem:[%s549_s27 + $0x68] sm:$0xff] %v285_v55 }
  0x21   : > { %302 = vst [vmem:[%s549_s27 + $0x70] sm:$0xff] %v286_v56  ;;  %303 = vst [vmem:[%s549_s27 + $0x78] sm:$0xff] %v287_v57 }
  0x22 PF: > { %s13_s14 = sadd.s32 1, %s491_s14   ;;  %s584_s12 = smov %s487_s13 }
  0x23   : > { %p10_p5 = scmp.ge.s32.totalorder %s13_s14, 6   ;;  %s585_s13 = smov %s587_s15 }
  0x25   :  { %12 = sbr.rel (!%p10_p5) target bundleno = 2 (0x2), region = 62 }

// kernel: unet_innermost_forward.4
= control target key start
LH: loop header
LB: loop body
LE: loop exit
PB: predicated region body
PF: predicated region fallthrough
CT: control target
= control target key end

     0   :  { %s1144_s15 = smov 0   ;;  %s1146_s16 = smov 0   ;;  %s1242_s0 = inlined_call_operand.vmem [shape: bf16[4,128,32], index: 0, kind: input, shape index: {}]   ;;  %s1243_s1 = inlined_call_operand.vmem [shape: bf16[4,32,128], index: 1, kind: input, shape index: {}]   ;;  %s1244_s2 = inlined_call_operand.vmem [shape: bf16[4,128,128], index: 2, kind: output, shape index: {0}]   ;;  %s1245_s3 = inlined_call_operand.vmem [shape: f32[4,1,128], index: 3, kind: output, shape index: {1}]   ;;  %s1246_s4 = inlined_call_operand.vmem [shape: f32[4,1,128], index: 4, kind: output, shape index: {2}]  }
   0x1   :  { %s1148_s17 = smov 0  }
   0x2 LB: > { %s34_s18 = sadd.s32 1, %s1111_s16  ;;  %p922_p0 = scmp.ge.s32.totalorder %s1115_s17, 1  ;;  %s1115_s17 = sphi %s1148_s17, %s15_s17   ;;  %s1111_s16 = sphi %s1146_s16, %s1248_s16   ;;  %s1107_s15 = sphi %s1144_s15, %s1247_s15  }
   0x3   : > { %p36_p1 = scmp.ge.s32.totalorder %s34_s18, 4  ;;  %p217_p2 = scmp.lt.s32.totalorder %s1115_s17, 5 }
   0x5   : > { %s1250_s18 = smov (%p36_p1, %s34_s18), 0  ;;  %p218_p3 = pnand %p922_p0, %p217_p2 }
   0x6   : > { %p270_p4 = scmp.lt.s32.totalorder (!%p218_p3), %s1107_s15, 3  ;;  %v1117_v5 = vmov (!%p218_p3), 0   ;;  %vm440_vm0 = vcmask (!%p218_p3), 261120   ;;  %v1118_v43 = vmov (!%p218_p3), 0.0  }
   0x7   : > { %221 = sbr.rel (%p218_p3) target bundleno = 288 (0x120), region = 28 }
   0xe   : > { %s1252_s15 = smov (!%p270_p4, %s1107_s15), 3 }
   0xf   : > { %s965_s19 = sshll.u32 %s1252_s15, 6  ;;  %s966_s20 = sshll.u32 %s1252_s15, 4 }
  0x10   : > { %s1171_s23 = scalar_lea.vmem %s1242_s0, %s965_s19  ;;  %s290_s26 = scalar_lea.vmem %s1243_s1, %s966_s20 }
  0x11   : > { %v1091_v0 = vld [vmem:[%s290_s26] sm:$0xff]   ;;  %v1092_v1 = vld [vmem:[%s290_s26 + $0x8] sm:$0xff]   ;;  %v340_v10 = vld [vmem:[%s1171_s23 + $0x10] sm:$0xf]  ;;  %s1204_s29 = scalar_lea.vmem %s1245_s3, %s1252_s15  ;;  %s1210_s6 = scalar_lea.vmem %s1246_s4, %s1252_s15 }
  0x12   : > { %1041 = vmatprep.subr.bf16.mxu0 %v1091_v0  ;;  %v336_v2 = vld [vmem:[%s1171_s23] sm:$0xf]  ;;  %v337_v3 = vld [vmem:[%s1171_s23 + $0x4] sm:$0xf]  ;;  %v338_v4 = vld [vmem:[%s1171_s23 + $0x8] sm:$0xf]  ;;  %1061 = vmatprep.subr.bf16.mxu1 %v1091_v0  ;;  %v356_v13 = vmax.bf16 %v1117_v5, %v340_v10  ;;  %s1219_s9 = scalar_lea.vmem %s1244_s2, %s965_s19 }
  0x13   : > { %1042 = vmatpush3.bf16.msra.mxu0 %v1091_v0  ;;  %v352_v6 = vmax.bf16 %v1117_v5, %v336_v2  ;;  %v353_v7 = vmax.bf16 %v1117_v5, %v337_v3  ;;  %v339_v8 = vld [vmem:[%s1171_s23 + $0xc] sm:$0xf]  ;;  %v354_v9 = vmax.bf16 %v1117_v5, %v338_v4  ;;  %1063 = vmatpush3.bf16.msra.mxu1 %v1091_v0  ;;  %v341_v11 = vld [vmem:[%s1171_s23 + $0x14] sm:$0xf]  ;;  %v344_v15 = vld [vmem:[%s1171_s23 + $0x20] sm:$0xf] }
  0x14   : > { %1043 = vmatprep.subr.bf16.mxu0 %v1092_v1  ;;  %v355_v12 = vmax.bf16 %v1117_v5, %v339_v8  ;;  %v357_v14 = vmax.bf16 %v1117_v5, %v341_v11  ;;  %1062 = vmatprep.subr.bf16.mxu1 %v1092_v1  ;;  %v345_v17 = vld [vmem:[%s1171_s23 + $0x24] sm:$0xf]  ;;  %v360_v18 = vmax.bf16 %v1117_v5, %v344_v15  ;;  %v346_v19 = vld [vmem:[%s1171_s23 + $0x28] sm:$0xf]  ;;  %v347_v20 = vld [vmem:[%s1171_s23 + $0x2c] sm:$0xf] }
  0x15   : > { %v929_v16 = vcombine.low %v352_v6, %v353_v7  ;;  %v361_v22 = vmax.bf16 %v1117_v5, %v345_v17  ;;  %v362_v23 = vmax.bf16 %v1117_v5, %v346_v19  ;;  %v348_v24 = vld [vmem:[%s1171_s23 + $0x30] sm:$0xf]  ;;  %v349_v25 = vld [vmem:[%s1171_s23 + $0x34] sm:$0xf]  ;;  %v342_v27 = vld [vmem:[%s1171_s23 + $0x18] sm:$0xf]  ;;  %v363_v29 = vmax.bf16 %v1117_v5, %v347_v20 }
  0x16   : > { %v930_v21 = vcombine.low %v354_v9, %v355_v12  ;;  %v931_v26 = vcombine.low %v356_v13, %v357_v14  ;;  %v343_v28 = vld [vmem:[%s1171_s23 + $0x1c] sm:$0xf]  ;;  %v364_v30 = vmax.bf16 %v1117_v5, %v348_v24  ;;  %v365_v32 = vmax.bf16 %v1117_v5, %v349_v25  ;;  %v350_v33 = vld [vmem:[%s1171_s23 + $0x38] sm:$0xf]  ;;  %315 = vst [vmem:[%s1204_s29] sm:$0x1] %v1118_v43 }
  0x17   : > { %1044 = vmatpush3.bf16.msra.mxu0 %v1092_v1  ;;  %1045 = vmatprep.mubr.msk.bf16.mxu0 %vm440_vm0, %v929_v16  ;;  %v933_v31 = vcombine.low %v360_v18, %v361_v22  ;;  %v351_v34 = vld [vmem:[%s1171_s23 + $0x3c] sm:$0xf]  ;;  %v934_v35 = vcombine.low %v362_v23, %v363_v29  ;;  %v358_v36 = vmax.bf16 %v1117_v5, %v342_v27 }
  0x18   : > { %1064 = vmatpush3.bf16.msra.mxu1 %v1092_v1  ;;  %v359_v37 = vmax.bf16 %v1117_v5, %v343_v28  ;;  %v935_v38 = vcombine.low %v364_v30, %v365_v32  ;;  %v366_v39 = vmax.bf16 %v1117_v5, %v350_v33  ;;  %v367_v40 = vmax.bf16 %v1117_v5, %v351_v34 }
  0x19   : > { %1053 = vmatprep.mubr.msk.bf16.mxu1 %vm440_vm0, %v933_v31  ;;  %316 = vst [vmem:[%s1210_s6] sm:$0x1] %v1118_v43 }
  0x1a   : > { %1046 = vmatmul.mubr.msk.bf16.vlgmr.msra.gmra.mrb[0].mxu0 %vm440_vm0, %v930_v21  ;;  %v932_v41 = vcombine.low %v358_v36, %v359_v37  ;;  %v936_v42 = vcombine.low %v366_v39, %v367_v40 }
  0x1b   : > { %1049 = vmatprep.mubr.msk.bf16.mxu0 %vm440_vm0, %v931_v26  ;;  %1054 = vmatmul.mubr.msk.bf16.vlgmr.msra.gmra.mrb[0].mxu1 %vm440_vm0, %v934_v35 }
  0x1c   : > { %1057 = vmatprep.mubr.msk.bf16.mxu1 %vm440_vm0, %v935_v38 }
  0x22   : > { %1050 = vmatmul.mubr.msk.bf16.gmra.mrb[4].mxu0 %vm440_vm0, %v932_v41 }
  0x23   : > { %1058 = vmatmul.mubr.msk.bf16.gmra.mrb[4].mxu1 %vm440_vm0, %v936_v42 }
  0xed   : > { %v1047_v44 = vpop.f32.mrb[0].mxu0 }
  0xee   : > { %v499_v45 = vpop.f32.mrb[1].mxu0  ;;  %v1055_v46 = vpop.f32.mrb[0].mxu1  ;;  %v720_v59 = vmul.f32 %v1047_v44, %v1047_v44 }
  0xef   : > { %v1048_v47 = vpop.f32.mrb[2].mxu0  ;;  %v531_v48 = vpop.f32.mrb[1].mxu1  ;;  %v718_v49 = vmul.f32 %v499_v45, %v499_v45  ;;  %v728_v31 = vmul.f32 %v1055_v46, %v1055_v46 }
  0xf0   : > { %v992_v50 = vpack.c.bf16 %v1048_v47, %v1047_v44  ;;  %v502_v51 = vpop.f32.mrb[3].mxu0  ;;  %v1056_v52 = vpop.f32.mrb[2].mxu1  ;;  %v721_v62 = vmul.f32 %v1048_v47, %v1048_v47  ;;  %v726_v25 = vmul.f32 %v531_v48, %v531_v48 }
  0xf1   : > { %v987_v53 = vpack.c.bf16 %v502_v51, %v499_v45  ;;  %v694_v54 = vadd.f32 %v502_v51, %v499_v45  ;;  %v719_v55 = vmul.f32 %v502_v51, %v502_v51  ;;  %v1012_v56 = vpack.c.bf16 %v1056_v52, %v1055_v46  ;;  %v534_v57 = vpop.f32.mrb[3].mxu1 }
  0xf2   : > { %1024 = vst [vmem:[%s1219_s9 + $0x8] sm:$0xff] %v992_v50   ;;  %v1007_v58 = vpack.c.bf16 %v534_v57, %v531_v48  ;;  %v727_v30 = vmul.f32 %v534_v57, %v534_v57  ;;  %v729_v34 = vmul.f32 %v1056_v52, %v1056_v52 }
  0xf3   : > { %988 = vst [vmem:[%s1219_s9] sm:$0xff] %v987_v53   ;;  %v695_v60 = vadd.f32 %v1047_v44, %v694_v54  ;;  %v734_v61 = vadd.f32 %v719_v55, %v718_v49  ;;  %1028 = vst [vmem:[%s1219_s9 + $0x28] sm:$0xff] %v1012_v56  }
  0xf4   : > { %1027 = vst [vmem:[%s1219_s9 + $0x20] sm:$0xff] %v1007_v58  }
  0xf5   : > { %v735_v63 = vadd.f32 %v734_v61, %v720_v59  ;;  %v1051_v0 = vpop.f32.mrb[4].mxu0  ;;  %v696_v1 = vadd.f32 %v1048_v47, %v695_v60  ;;  %v693_v59 = vld [vmem:[%s1204_s29] sm:$0x1] }
  0xf6   : > { %v515_v2 = vpop.f32.mrb[5].mxu0  ;;  %v1059_v3 = vpop.f32.mrb[4].mxu1  ;;  %v724_v19 = vmul.f32 %v1051_v0, %v1051_v0 }
  0xf7   : > { %v697_v4 = vadd.f32 %v696_v1, %v515_v2  ;;  %v722_v5 = vmul.f32 %v515_v2, %v515_v2  ;;  %v736_v6 = vadd.f32 %v735_v63, %v721_v62  ;;  %v1052_v7 = vpop.f32.mrb[6].mxu0  ;;  %v547_v8 = vpop.f32.mrb[5].mxu1  ;;  %v732_v43 = vmul.f32 %v1059_v3, %v1059_v3  ;;  %v717_v62 = vld [vmem:[%s1210_s6] sm:$0x1] }
  0xf8   : > { %v1002_v9 = vpack.c.bf16 %v1052_v7, %v1051_v0  ;;  %v518_v10 = vpop.f32.mrb[7].mxu0  ;;  %v1060_v11 = vpop.f32.mrb[6].mxu1  ;;  %v725_v22 = vmul.f32 %v1052_v7, %v1052_v7  ;;  %v730_v37 = vmul.f32 %v547_v8, %v547_v8 }
  0xf9   : > { %v737_v12 = vadd.f32 %v736_v6, %v722_v5  ;;  %v997_v13 = vpack.c.bf16 %v518_v10, %v515_v2  ;;  %v698_v14 = vadd.f32 %v697_v4, %v518_v10  ;;  %v723_v15 = vmul.f32 %v518_v10, %v518_v10  ;;  %v550_v16 = vpop.f32.mrb[7].mxu1 }
  0xfa   : > { %1026 = vst [vmem:[%s1219_s9 + $0x18] sm:$0xff] %v1002_v9   ;;  %v1022_v17 = vpack.c.bf16 %v1060_v11, %v1059_v3  ;;  %v1017_v18 = vpack.c.bf16 %v550_v16, %v547_v8  ;;  %v731_v42 = vmul.f32 %v550_v16, %v550_v16  ;;  %v733_v47 = vmul.f32 %v1060_v11, %v1060_v11 }
  0xfb   : > { %1025 = vst [vmem:[%s1219_s9 + $0x10] sm:$0xff] %v997_v13   ;;  %v699_v20 = vadd.f32 %v1051_v0, %v698_v14  ;;  %v738_v21 = vadd.f32 %v737_v12, %v723_v15 }
  0xfc   : > { %1030 = vst [vmem:[%s1219_s9 + $0x38] sm:$0xff] %v1022_v17   ;;  %1029 = vst [vmem:[%s1219_s9 + $0x30] sm:$0xff] %v1017_v18  }
  0xfd   : > { %v739_v23 = vadd.f32 %v738_v21, %v724_v19  ;;  %v700_v24 = vadd.f32 %v1052_v7, %v699_v20 }
  0xff   : > { %v701_v26 = vadd.f32 %v700_v24, %v531_v48  ;;  %v740_v27 = vadd.f32 %v739_v23, %v725_v22 }
 0x101   : > { %v741_v28 = vadd.f32 %v740_v27, %v726_v25  ;;  %v702_v29 = vadd.f32 %v701_v26, %v534_v57 }
 0x103   : > { %v703_v32 = vadd.f32 %v1055_v46, %v702_v29  ;;  %v742_v33 = vadd.f32 %v741_v28, %v727_v30 }
 0x105   : > { %v743_v35 = vadd.f32 %v742_v33, %v728_v31  ;;  %v704_v36 = vadd.f32 %v1056_v52, %v703_v32 }
 0x107   : > { %v705_v38 = vadd.f32 %v704_v36, %v547_v8  ;;  %v744_v39 = vadd.f32 %v743_v35, %v729_v34 }
 0x109   : > { %v745_v40 = vadd.f32 %v744_v39, %v730_v37  ;;  %v706_v41 = vadd.f32 %v705_v38, %v550_v16 }
 0x10b   : > { %v707_v44 = vadd.f32 %v1059_v3, %v706_v41  ;;  %v746_v45 = vadd.f32 %v745_v40, %v731_v42 }
 0x10d   : > { %v708_v48 = vadd.f32 %v1060_v11, %v707_v44  ;;  %v747_v49 = vadd.f32 %v746_v45, %v732_v43 }
 0x10f   : > { %v709_v50 = vrot.slane %v708_v48, 4  ;;  %v748_v46 = vadd.f32 %v747_v49, %v733_v47 }
 0x111   : > { %v710_v51 = vadd.f32 %v709_v50, %v708_v48  ;;  %v749_v52 = vrot.slane %v748_v46, 4 }
 0x113   : > { %v711_v53 = vrot.slane %v710_v51, 2  ;;  %v750_v54 = vadd.f32 %v749_v52, %v748_v46 }
 0x115   : > { %v712_v55 = vadd.f32 %v711_v53, %v710_v51  ;;  %v751_v56 = vrot.slane %v750_v54, 2 }
 0x117   : > { %v713_v57 = vrot.slane %v712_v55, 1  ;;  %v752_v58 = vadd.f32 %v751_v56, %v750_v54 }
 0x119   : > { %v714_v60 = vadd.f32 %v713_v57, %v712_v55  ;;  %v753_v61 = vrot.slane %v752_v58, 1 }
 0x11b   : > { %v715_v63 = vadd.f32 %v714_v60, %v693_v59  ;;  %v754_v0 = vadd.f32 %v753_v61, %v752_v58 }
 0x11d   : > { %716 = vst [vmem:[%s1204_s29] sm:$0x1] %v715_v63  ;;  %v755_v1 = vadd.f32 %v754_v0, %v717_v62 }
 0x11f   : > { %756 = vst [vmem:[%s1210_s6] sm:$0x1] %v755_v1 }
 0x120 PF: > { %s15_s17 = sadd.s32 1, %s1115_s17   ;;  %s1247_s15 = smov %s1111_s16 }
 0x121   : > { %p12_p5 = scmp.ge.s32.totalorder %s15_s17, 6   ;;  %s1248_s16 = smov %s1250_s18 }
 0x123   :  { %14 = sbr.rel (!%p12_p5) target bundleno = 2 (0x2), region = 97 }

</bundles_post_ra>
